<compile_context>
chip_gen: v7x
topology: tpu7x:2x2x1
jax: 0.10.0
libtpu: 0.0.40
codegen_flags: <defaults>
</compile_context>

<pallas_src>
import functools

import jax
import jax.numpy as jnp
from jax import lax
from jax.experimental import pallas as pl
from jax.experimental.pallas import tpu as pltpu


def _basic_block_kernel(x_ref, w1_ref, w2_ref, o_ref, pad_ref, patch_ref, *, W):
    """Fused conv3x3+BN1+ReLU -> conv3x3+BN2+FiLM -> +identity -> ReLU for one sample.

    x_ref     : (C, H*W)            input sample, NCHW with flattened spatial (lanes = H*W)
    w1_ref    : (C, 9*C + 1)        conv1 weights * bn1_scale; last column = bn1_shift
    w2_ref    : (C, 9*C + 1)        conv2 weights * bn2_scale * gamma; last col = bn2_shift*gamma + beta
    o_ref     : (C, H*W)            output sample
    pad_ref   : (C, H*W + 2*(W+1))  VMEM flat halo staging buffer
    patch_ref : (9*C + 1, H*W)      VMEM im2col matrix (9 shifted taps + ones row)
    """
    C, HW = x_ref.shape
    Wp = W + 1                       # halo width on each side of the flattened spatial axis
    f32 = jnp.float32

    # Column-validity masks (row out-of-range is absorbed by the zero halo).
    pos = lax.broadcasted_iota(jnp.int32, (1, HW), 1)
    col = pos % W
    left_ok = col >= 1               # taps with dx == 0 (read column x-1)
    right_ok = col <= W - 2          # taps with dx == 2 (read column x+1)

    # Zero the halo; the interior is fully rewritten each grid step (safe across steps).
    pad_ref[:, :Wp] = jnp.zeros((C, Wp), f32)
    pad_ref[:, Wp + HW:] = jnp.zeros((C, Wp), f32)
    # Ones row: makes the folded BN/FiLM shifts (last weight column) part of the matmul.
    patch_ref[9 * C:, :] = jnp.ones((1, HW), f32)

    def im2col(feat):
        """Scatter the 9 shifted 3x3 taps of feat (C, HW) into patch_ref rows [0, 9*C)."""
        pad_ref[:, Wp:Wp + HW] = feat
        pf = pad_ref[...]
        for dy in range(3):
            for dx in range(3):
                start = Wp + (dy - 1) * W + (dx - 1)          # static lane offset
                tap = pf[:, start:start + HW]
                if dx == 0:
                    tap = jnp.where(left_ok, tap, 0.0)
                elif dx == 2:
                    tap = jnp.where(right_ok, tap, 0.0)
                t = dy * 3 + dx
                patch_ref[t * C:(t + 1) * C, :] = tap

    x = x_ref[...]

    # ---- conv1 (+ folded BN1) as a single MXU matmul, then ReLU ----
    im2col(x)
    out1 = jnp.maximum(
        jnp.dot(w1_ref[...], patch_ref[...], preferred_element_type=f32), 0.0)

    # ---- conv2 (+ folded BN2 + FiLM) as a single MXU matmul ----
    im2col(out1)
    out2 = jnp.dot(w2_ref[...], patch_ref[...], preferred_element_type=f32)

    # ---- residual add (stride=1, no downsample => identity = x) + final ReLU ----
    o_ref[...] = jnp.maximum(out2 + x, 0.0)


def _vmem_limit_bytes(C, HW, K, Wp):
    """Explicit scoped-VMEM request: double-buffered pipeline blocks + scratch + headroom."""
    rup = lambda v, m: -(-v // m) * m
    tile = lambda s, l: rup(s, 8) * rup(l, 128) * 4          # f32, (8,128)-padded bytes
    pipeline = 2 * (2 * tile(C, HW) + 2 * tile(C, K))        # x, out, w1, w2 blocks (x2 buffers)
    scratch = tile(C, HW + 2 * Wp) + tile(K, HW)
    return int(min(pipeline + scratch + (8 << 20), 64 << 20))


@jax.jit
def basic_block_pallas(x_nchw, w1_oihw, w2_oihw,
                       bn1_scale, bn1_shift, bn2_scale, bn2_shift,
                       gamma, beta):
    """NCHW in / NCHW out. Inference-mode BN folded; FiLM folded per-sample into conv2 weights."""
    B, Cin, H, W = x_nchw.shape
    Cmid, Cout = w1_oihw.shape[0], w2_oihw.shape[0]
    # stride=1 / downsample=None path: identity residual requires matching channel counts.
    assert Cin == Cmid == Cout, \
        "BasicBlock Pallas kernel supports inplanes == planes (stride=1, downsample=None)"
    C, HW, K, Wp = Cin, H * W, 9 * Cin + 1, W + 1
    f32 = jnp.float32

    x_flat = x_nchw.astype(f32).reshape(B, C, HW)            # free reshape: no transpose, no pad

    # Fold BN1 into conv1:  y = (x * w1) * s1 + b1  ->  weights scaled per out-channel, bias column.
    w1_flat = jnp.transpose(w1_oihw.astype(f32), (0, 2, 3, 1)).reshape(C, 9 * C)   # (co, ky, kx, ci)
    w1_aug = jnp.concatenate([w1_flat * bn1_scale[:, None],
                              bn1_shift[:, None]], axis=1)                          # (C, K)

    # Fold BN2 + FiLM into per-sample conv2:  ((x * w2) * s2 + b2) * g + be
    #                                      =   x * (w2 * s2 * g) + (b2 * g + be)
    w2_flat = jnp.transpose(w2_oihw.astype(f32), (0, 2, 3, 1)).reshape(C, 9 * C)
    g = gamma.astype(f32)
    eff_scale = bn2_scale[None, :] * g                        # (B, C)
    eff_shift = bn2_shift[None, :] * g + beta.astype(f32)     # (B, C)
    w2_aug = jnp.concatenate([w2_flat[None] * eff_scale[:, :, None],
                              eff_shift[:, :, None]], axis=2)                       # (B, C, K)

    kernel = functools.partial(_basic_block_kernel, W=W)

    out_flat = pl.pallas_call(
        kernel,
        out_shape=jax.ShapeDtypeStruct((B, C, HW), f32),
        grid=(B,),
        in_specs=[
            pl.BlockSpec((None, C, HW), lambda b: (b, 0, 0)),   # x: one sample per grid step
            pl.BlockSpec((C, K), lambda b: (0, 0)),             # shared conv1 weights
            pl.BlockSpec((None, C, K), lambda b: (b, 0, 0)),    # per-sample conv2 weights (FiLM folded)
        ],
        out_specs=pl.BlockSpec((None, C, HW), lambda b: (b, 0, 0)),
        scratch_shapes=[
            pltpu.VMEM((C, HW + 2 * Wp), f32),   # flat halo staging buffer
            pltpu.VMEM((K, HW), f32),            # im2col matrix (9 taps + ones row)
        ],
        compiler_params=pltpu.CompilerParams(
            dimension_semantics=("parallel",),   # batch shards across TCs (v7x megacore)
            vmem_limit_bytes=_vmem_limit_bytes(C, HW, K, Wp),
        ),
    )(x_flat, w1_aug, w2_aug)

    return out_flat.reshape(B, C, H, W)


def basic_block_reference(x_nchw, w1_oihw, w2_oihw,
                          bn1_scale, bn1_shift, bn2_scale, bn2_shift,
                          gamma, beta):
    """Pure-JAX reference replicating the PyTorch forward (eval-mode BN)."""
    dn = ('NCHW', 'OIHW', 'NCHW')
    out = lax.conv_general_dilated(x_nchw, w1_oihw, (1, 1), ((1, 1), (1, 1)),
                                   dimension_numbers=dn)
    out = out * bn1_scale[None, :, None, None] + bn1_shift[None, :, None, None]
    out = jnp.maximum(out, 0.0)
    out = lax.conv_general_dilated(out, w2_oihw, (1, 1), ((1, 1), (1, 1)),
                                   dimension_numbers=dn)
    out = out * bn2_scale[None, :, None, None] + bn2_shift[None, :, None, None]
    out = out * gamma[:, :, None, None] + beta[:, :, None, None]
    out = out + x_nchw
    return jnp.maximum(out, 0.0)


if __name__ == "__main__":
    key = jax.random.PRNGKey(0)
    ks = jax.random.split(key, 12)

    B, C, H, W = 2, 4, 16, 16          # inplanes = planes = 4, stride = 1
    inplanes = planes = C
    eps = 1e-5

    # Input (PyTorch NCHW convention)
    x = jax.random.normal(ks[0], (B, inplanes, H, W), dtype=jnp.float32)

    # conv weights, torch OIHW shape (out, in, 3, 3), bias=False
    w1 = 0.1 * jax.random.normal(ks[1], (planes, inplanes, 3, 3), dtype=jnp.float32)
    w2 = 0.1 * jax.random.normal(ks[2], (planes, planes, 3, 3), dtype=jnp.float32)

    # BatchNorm2d params + running stats (deterministic), folded to scale/shift
    bn1_w = 1.0 + 0.1 * jax.random.normal(ks[3], (planes,), dtype=jnp.float32)
    bn1_b = 0.1 * jax.random.normal(ks[4], (planes,), dtype=jnp.float32)
    bn1_mean = 0.1 * jax.random.normal(ks[5], (planes,), dtype=jnp.float32)
    bn1_var = 0.5 + jnp.abs(jax.random.normal(ks[6], (planes,), dtype=jnp.float32))
    bn2_w = 1.0 + 0.1 * jax.random.normal(ks[7], (planes,), dtype=jnp.float32)
    bn2_b = 0.1 * jax.random.normal(ks[8], (planes,), dtype=jnp.float32)
    bn2_mean = 0.1 * jax.random.normal(ks[9], (planes,), dtype=jnp.float32)
    bn2_var = 0.5 + jnp.abs(jax.random.normal(ks[10], (planes,), dtype=jnp.float32))

    bn1_scale = bn1_w / jnp.sqrt(bn1_var + eps)
    bn1_shift = bn1_b - bn1_mean * bn1_scale
    bn2_scale = bn2_w / jnp.sqrt(bn2_var + eps)
    bn2_shift = bn2_b - bn2_mean * bn2_scale

    # FiLM modulation (per-sample, per-channel), as in FiLM ResNet: (B, planes)
    gb = jax.random.normal(ks[11], (2, B, planes), dtype=jnp.float32)
    gamma = 1.0 + 0.1 * gb[0]
    beta = 0.1 * gb[1]

    out = basic_block_pallas(x, w1, w2, bn1_scale, bn1_shift,
                             bn2_scale, bn2_shift, gamma, beta)
    out = jax.block_until_ready(out)

    ref = basic_block_reference(x, w1, w2, bn1_scale, bn1_shift,
                                bn2_scale, bn2_shift, gamma, beta)
    ref = jax.block_until_ready(ref)

    assert out.shape == (B, planes, H, W) and out.dtype == jnp.float32
    max_err = float(jnp.max(jnp.abs(out - ref)))
    assert jnp.allclose(out, ref, atol=1e-4, rtol=1e-4), f"max abs err {max_err}"

    print("KERNEL_OK")
</pallas_src>

<mosaic_0001>
module attributes {stable_mosaic.version = 11 : i64} {
  func.func @_basic_block_kernel(%arg0: i32, %arg1: memref<1x4x256xf32, #tpu.memory_space<vmem>>, %arg2: memref<4x37xf32, #tpu.memory_space<vmem>>, %arg3: memref<1x4x37xf32, #tpu.memory_space<vmem>>, %arg4: memref<1x4x256xf32, #tpu.memory_space<vmem>>, %arg5: memref<4x290xf32, #tpu.memory_space<vmem>>, %arg6: memref<37x256xf32, #tpu.memory_space<vmem>>) attributes {dimension_semantics = [#tpu.dimension_semantics<parallel>], iteration_bounds = array<i64: 2>, scalar_prefetch = 0 : i64, scratch_operands = 2 : i64, tpu.core_type = #tpu.core_type<tc>, window_params = [{transform_indices = @transform_0, window_bounds = array<i64: 1, 4, 256>}, {pipeline_mode = #tpu.pipeline_mode<synchronous>, transform_indices = @transform_1, window_bounds = array<i64: 4, 37>}, {transform_indices = @transform_2, window_bounds = array<i64: 1, 4, 37>}, {transform_indices = @transform_3, window_bounds = array<i64: 1, 4, 256>}]} {
    %0 = tpu.iota {dimensions = array<i32: 1>} : vector<1x256xi32>
    %c16_i32 = arith.constant 16 : i32
    %c0_i32 = arith.constant 0 : i32
    %1 = arith.cmpi eq, %c16_i32, %c0_i32 : i32
    %c1_i32 = arith.constant 1 : i32
    %2 = arith.select %1, %c1_i32, %c16_i32 : i32
    %3 = vector.broadcast %2 : i32 to vector<1x256xi32>
    %4 = arith.remsi %0, %3 : vector<1x256xi32>
    %c0_i32_0 = arith.constant 0 : i32
    %5 = vector.broadcast %c0_i32_0 : i32 to vector<1x256xi32>
    %6 = arith.cmpi ne, %4, %5 : vector<1x256xi32>
    %c0_i32_1 = arith.constant 0 : i32
    %7 = vector.broadcast %c0_i32_1 : i32 to vector<1x256xi32>
    %8 = arith.cmpi slt, %4, %7 : vector<1x256xi32>
    %c0_i32_2 = arith.constant 0 : i32
    %9 = arith.cmpi slt, %2, %c0_i32_2 : i32
    %10 = vector.broadcast %9 : i1 to vector<1x256xi1>
    %11 = vector.broadcast %10 : vector<1x256xi1> to vector<1x256xi1>
    %12 = arith.xori %8, %11 : vector<1x256xi1>
    %13 = arith.andi %12, %6 : vector<1x256xi1>
    %14 = vector.broadcast %2 : i32 to vector<1x256xi32>
    %15 = arith.addi %4, %14 : vector<1x256xi32>
    %16 = arith.select %13, %15, %4 : vector<1x256xi1>, vector<1x256xi32>
    %c1_i32_3 = arith.constant 1 : i32
    %17 = vector.broadcast %c1_i32_3 : i32 to vector<1x256xi32>
    %18 = arith.cmpi sge, %16, %17 : vector<1x256xi32>
    %c14_i32 = arith.constant 14 : i32
    %19 = vector.broadcast %c14_i32 : i32 to vector<1x256xi32>
    %20 = arith.cmpi sle, %16, %19 : vector<1x256xi32>
    %cst = arith.constant 0.000000e+00 : f32
    %21 = vector.broadcast %cst : f32 to vector<4x17xf32>
    %c0 = arith.constant 0 : index
    %c0_4 = arith.constant 0 : index
    %22 = vector.load %arg5[%c0, %c0_4] : memref<4x290xf32, #tpu.memory_space<vmem>>, vector<4x17xf32>
    tpu.vector_store %arg5[%c0, %c0_4], %21 {strides = array<i32>} : memref<4x290xf32, #tpu.memory_space<vmem>>, vector<4x17xf32>,
    %cst_5 = arith.constant 0.000000e+00 : f32
    %23 = vector.broadcast %cst_5 : f32 to vector<4x17xf32>
    %c0_6 = arith.constant 0 : index
    %c273 = arith.constant 273 : index
    %24 = vector.load %arg5[%c0_6, %c273] : memref<4x290xf32, #tpu.memory_space<vmem>>, vector<4x17xf32>
    tpu.vector_store %arg5[%c0_6, %c273], %23 {strides = array<i32>} : memref<4x290xf32, #tpu.memory_space<vmem>>, vector<4x17xf32>,
    %cst_7 = arith.constant 1.000000e+00 : f32
    %25 = vector.broadcast %cst_7 : f32 to vector<1x256xf32>
    %c36 = arith.constant 36 : index
    %c0_8 = arith.constant 0 : index
    %26 = vector.load %arg6[%c36, %c0_8] : memref<37x256xf32, #tpu.memory_space<vmem>>, vector<1x256xf32>
    tpu.vector_store %arg6[%c36, %c0_8], %25 {strides = array<i32>} : memref<37x256xf32, #tpu.memory_space<vmem>>, vector<1x256xf32>,
    %c0_9 = arith.constant 0 : index
    %c0_10 = arith.constant 0 : index
    %c0_11 = arith.constant 0 : index
    %27 = vector.load %arg1[%c0_9, %c0_10, %c0_11] : memref<1x4x256xf32, #tpu.memory_space<vmem>>, vector<1x4x256xf32>
    %28 = vector.shape_cast %27 : vector<1x4x256xf32> to vector<4x256xf32>
    %c0_12 = arith.constant 0 : index
    %c17 = arith.constant 17 : index
    %29 = vector.load %arg5[%c0_12, %c17] : memref<4x290xf32, #tpu.memory_space<vmem>>, vector<4x256xf32>
    tpu.vector_store %arg5[%c0_12, %c17], %28 {strides = array<i32>} : memref<4x290xf32, #tpu.memory_space<vmem>>, vector<4x256xf32>,
    %c0_13 = arith.constant 0 : index
    %c0_14 = arith.constant 0 : index
    %30 = vector.load %arg5[%c0_13, %c0_14] : memref<4x290xf32, #tpu.memory_space<vmem>>, vector<4x290xf32>
    %31 = vector.extract_strided_slice %30 {offsets = [0, 0], sizes = [4, 256], strides = [1, 1]} : vector<4x290xf32> to vector<4x256xf32>
    %cst_15 = arith.constant 0.000000e+00 : f32
    %32 = vector.shape_cast %18 : vector<1x256xi1> to vector<1x256xi1>
    %33 = vector.broadcast %32 : vector<1x256xi1> to vector<4x256xi1>
    %34 = vector.broadcast %cst_15 : f32 to vector<4x256xf32>
    %35 = arith.select %33, %31, %34 : vector<4x256xi1>, vector<4x256xf32>
    %c0_16 = arith.constant 0 : index
    %c0_17 = arith.constant 0 : index
    %36 = vector.load %arg6[%c0_16, %c0_17] : memref<37x256xf32, #tpu.memory_space<vmem>>, vector<4x256xf32>
    tpu.vector_store %arg6[%c0_16, %c0_17], %35 {strides = array<i32>} : memref<37x256xf32, #tpu.memory_space<vmem>>, vector<4x256xf32>,
    %37 = vector.extract_strided_slice %30 {offsets = [0, 1], sizes = [4, 256], strides = [1, 1]} : vector<4x290xf32> to vector<4x256xf32>
    %c4 = arith.constant 4 : index
    %c0_18 = arith.constant 0 : index
    %38 = vector.load %arg6[%c4, %c0_18] : memref<37x256xf32, #tpu.memory_space<vmem>>, vector<4x256xf32>
    tpu.vector_store %arg6[%c4, %c0_18], %37 {strides = array<i32>} : memref<37x256xf32, #tpu.memory_space<vmem>>, vector<4x256xf32>,
    %39 = vector.extract_strided_slice %30 {offsets = [0, 2], sizes = [4, 256], strides = [1, 1]} : vector<4x290xf32> to vector<4x256xf32>
    %cst_19 = arith.constant 0.000000e+00 : f32
    %40 = vector.shape_cast %20 : vector<1x256xi1> to vector<1x256xi1>
    %41 = vector.broadcast %40 : vector<1x256xi1> to vector<4x256xi1>
    %42 = vector.broadcast %cst_19 : f32 to vector<4x256xf32>
    %43 = arith.select %41, %39, %42 : vector<4x256xi1>, vector<4x256xf32>
    %c8 = arith.constant 8 : index
    %c0_20 = arith.constant 0 : index
    %44 = vector.load %arg6[%c8, %c0_20] : memref<37x256xf32, #tpu.memory_space<vmem>>, vector<4x256xf32>
    tpu.vector_store %arg6[%c8, %c0_20], %43 {strides = array<i32>} : memref<37x256xf32, #tpu.memory_space<vmem>>, vector<4x256xf32>,
    %45 = vector.extract_strided_slice %30 {offsets = [0, 16], sizes = [4, 256], strides = [1, 1]} : vector<4x290xf32> to vector<4x256xf32>
    %cst_21 = arith.constant 0.000000e+00 : f32
    %46 = vector.shape_cast %18 : vector<1x256xi1> to vector<1x256xi1>
    %47 = vector.broadcast %46 : vector<1x256xi1> to vector<4x256xi1>
    %48 = vector.broadcast %cst_21 : f32 to vector<4x256xf32>
    %49 = arith.select %47, %45, %48 : vector<4x256xi1>, vector<4x256xf32>
    %c12 = arith.constant 12 : index
    %c0_22 = arith.constant 0 : index
    %50 = vector.load %arg6[%c12, %c0_22] : memref<37x256xf32, #tpu.memory_space<vmem>>, vector<4x256xf32>
    tpu.vector_store %arg6[%c12, %c0_22], %49 {strides = array<i32>} : memref<37x256xf32, #tpu.memory_space<vmem>>, vector<4x256xf32>,
    %51 = vector.extract_strided_slice %30 {offsets = [0, 17], sizes = [4, 256], strides = [1, 1]} : vector<4x290xf32> to vector<4x256xf32>
    %c16 = arith.constant 16 : index
    %c0_23 = arith.constant 0 : index
    %52 = vector.load %arg6[%c16, %c0_23] : memref<37x256xf32, #tpu.memory_space<vmem>>, vector<4x256xf32>
    tpu.vector_store %arg6[%c16, %c0_23], %51 {strides = array<i32>} : memref<37x256xf32, #tpu.memory_space<vmem>>, vector<4x256xf32>,
    %53 = vector.extract_strided_slice %30 {offsets = [0, 18], sizes = [4, 256], strides = [1, 1]} : vector<4x290xf32> to vector<4x256xf32>
    %cst_24 = arith.constant 0.000000e+00 : f32
    %54 = vector.shape_cast %20 : vector<1x256xi1> to vector<1x256xi1>
    %55 = vector.broadcast %54 : vector<1x256xi1> to vector<4x256xi1>
    %56 = vector.broadcast %cst_24 : f32 to vector<4x256xf32>
    %57 = arith.select %55, %53, %56 : vector<4x256xi1>, vector<4x256xf32>
    %c20 = arith.constant 20 : index
    %c0_25 = arith.constant 0 : index
    %58 = vector.load %arg6[%c20, %c0_25] : memref<37x256xf32, #tpu.memory_space<vmem>>, vector<4x256xf32>
    tpu.vector_store %arg6[%c20, %c0_25], %57 {strides = array<i32>} : memref<37x256xf32, #tpu.memory_space<vmem>>, vector<4x256xf32>,
    %59 = vector.extract_strided_slice %30 {offsets = [0, 32], sizes = [4, 256], strides = [1, 1]} : vector<4x290xf32> to vector<4x256xf32>
    %cst_26 = arith.constant 0.000000e+00 : f32
    %60 = vector.shape_cast %18 : vector<1x256xi1> to vector<1x256xi1>
    %61 = vector.broadcast %60 : vector<1x256xi1> to vector<4x256xi1>
    %62 = vector.broadcast %cst_26 : f32 to vector<4x256xf32>
    %63 = arith.select %61, %59, %62 : vector<4x256xi1>, vector<4x256xf32>
    %c24 = arith.constant 24 : index
    %c0_27 = arith.constant 0 : index
    %64 = vector.load %arg6[%c24, %c0_27] : memref<37x256xf32, #tpu.memory_space<vmem>>, vector<4x256xf32>
    tpu.vector_store %arg6[%c24, %c0_27], %63 {strides = array<i32>} : memref<37x256xf32, #tpu.memory_space<vmem>>, vector<4x256xf32>,
    %65 = vector.extract_strided_slice %30 {offsets = [0, 33], sizes = [4, 256], strides = [1, 1]} : vector<4x290xf32> to vector<4x256xf32>
    %c28 = arith.constant 28 : index
    %c0_28 = arith.constant 0 : index
    %66 = vector.load %arg6[%c28, %c0_28] : memref<37x256xf32, #tpu.memory_space<vmem>>, vector<4x256xf32>
    tpu.vector_store %arg6[%c28, %c0_28], %65 {strides = array<i32>} : memref<37x256xf32, #tpu.memory_space<vmem>>, vector<4x256xf32>,
    %67 = vector.extract_strided_slice %30 {offsets = [0, 34], sizes = [4, 256], strides = [1, 1]} : vector<4x290xf32> to vector<4x256xf32>
    %cst_29 = arith.constant 0.000000e+00 : f32
    %68 = vector.shape_cast %20 : vector<1x256xi1> to vector<1x256xi1>
    %69 = vector.broadcast %68 : vector<1x256xi1> to vector<4x256xi1>
    %70 = vector.broadcast %cst_29 : f32 to vector<4x256xf32>
    %71 = arith.select %69, %67, %70 : vector<4x256xi1>, vector<4x256xf32>
    %c32 = arith.constant 32 : index
    %c0_30 = arith.constant 0 : index
    %72 = vector.load %arg6[%c32, %c0_30] : memref<37x256xf32, #tpu.memory_space<vmem>>, vector<4x256xf32>
    tpu.vector_store %arg6[%c32, %c0_30], %71 {strides = array<i32>} : memref<37x256xf32, #tpu.memory_space<vmem>>, vector<4x256xf32>,
    %c0_31 = arith.constant 0 : index
    %c0_32 = arith.constant 0 : index
    %73 = vector.load %arg2[%c0_31, %c0_32] : memref<4x37xf32, #tpu.memory_space<vmem>>, vector<4x37xf32>
    %c0_33 = arith.constant 0 : index
    %c0_34 = arith.constant 0 : index
    %74 = vector.load %arg6[%c0_33, %c0_34] : memref<37x256xf32, #tpu.memory_space<vmem>>, vector<37x256xf32>
    %cst_35 = arith.constant dense<0.000000e+00> : vector<4x256xf32>
    %75 = tpu.matmul %73, %74, %cst_35 {dimension_numbers = #tpu.dot_dimension_numbers<[1], [0], [0], [1], [0, 0, 1, 1], [], []>} : vector<4x37xf32>, vector<37x256xf32>, vector<4x256xf32> -> vector<4x256xf32>
    %cst_36 = arith.constant 0.000000e+00 : f32
    %76 = vector.broadcast %cst_36 : f32 to vector<4x256xf32>
    %77 = arith.maximumf %75, %76 : vector<4x256xf32>
    %c0_37 = arith.constant 0 : index
    %c17_38 = arith.constant 17 : index
    %78 = vector.load %arg5[%c0_37, %c17_38] : memref<4x290xf32, #tpu.memory_space<vmem>>, vector<4x256xf32>
    tpu.vector_store %arg5[%c0_37, %c17_38], %77 {strides = array<i32>} : memref<4x290xf32, #tpu.memory_space<vmem>>, vector<4x256xf32>,
    %c0_39 = arith.constant 0 : index
    %c0_40 = arith.constant 0 : index
    %79 = vector.load %arg5[%c0_39, %c0_40] : memref<4x290xf32, #tpu.memory_space<vmem>>, vector<4x290xf32>
    %80 = vector.extract_strided_slice %79 {offsets = [0, 0], sizes = [4, 256], strides = [1, 1]} : vector<4x290xf32> to vector<4x256xf32>
    %cst_41 = arith.constant 0.000000e+00 : f32
    %81 = vector.shape_cast %18 : vector<1x256xi1> to vector<1x256xi1>
    %82 = vector.broadcast %81 : vector<1x256xi1> to vector<4x256xi1>
    %83 = vector.broadcast %cst_41 : f32 to vector<4x256xf32>
    %84 = arith.select %82, %80, %83 : vector<4x256xi1>, vector<4x256xf32>
    %c0_42 = arith.constant 0 : index
    %c0_43 = arith.constant 0 : index
    %85 = vector.load %arg6[%c0_42, %c0_43] : memref<37x256xf32, #tpu.memory_space<vmem>>, vector<4x256xf32>
    tpu.vector_store %arg6[%c0_42, %c0_43], %84 {strides = array<i32>} : memref<37x256xf32, #tpu.memory_space<vmem>>, vector<4x256xf32>,
    %86 = vector.extract_strided_slice %79 {offsets = [0, 1], sizes = [4, 256], strides = [1, 1]} : vector<4x290xf32> to vector<4x256xf32>
    %c4_44 = arith.constant 4 : index
    %c0_45 = arith.constant 0 : index
    %87 = vector.load %arg6[%c4_44, %c0_45] : memref<37x256xf32, #tpu.memory_space<vmem>>, vector<4x256xf32>
    tpu.vector_store %arg6[%c4_44, %c0_45], %86 {strides = array<i32>} : memref<37x256xf32, #tpu.memory_space<vmem>>, vector<4x256xf32>,
    %88 = vector.extract_strided_slice %79 {offsets = [0, 2], sizes = [4, 256], strides = [1, 1]} : vector<4x290xf32> to vector<4x256xf32>
    %cst_46 = arith.constant 0.000000e+00 : f32
    %89 = vector.shape_cast %20 : vector<1x256xi1> to vector<1x256xi1>
    %90 = vector.broadcast %89 : vector<1x256xi1> to vector<4x256xi1>
    %91 = vector.broadcast %cst_46 : f32 to vector<4x256xf32>
    %92 = arith.select %90, %88, %91 : vector<4x256xi1>, vector<4x256xf32>
    %c8_47 = arith.constant 8 : index
    %c0_48 = arith.constant 0 : index
    %93 = vector.load %arg6[%c8_47, %c0_48] : memref<37x256xf32, #tpu.memory_space<vmem>>, vector<4x256xf32>
    tpu.vector_store %arg6[%c8_47, %c0_48], %92 {strides = array<i32>} : memref<37x256xf32, #tpu.memory_space<vmem>>, vector<4x256xf32>,
    %94 = vector.extract_strided_slice %79 {offsets = [0, 16], sizes = [4, 256], strides = [1, 1]} : vector<4x290xf32> to vector<4x256xf32>
    %cst_49 = arith.constant 0.000000e+00 : f32
    %95 = vector.shape_cast %18 : vector<1x256xi1> to vector<1x256xi1>
    %96 = vector.broadcast %95 : vector<1x256xi1> to vector<4x256xi1>
    %97 = vector.broadcast %cst_49 : f32 to vector<4x256xf32>
    %98 = arith.select %96, %94, %97 : vector<4x256xi1>, vector<4x256xf32>
    %c12_50 = arith.constant 12 : index
    %c0_51 = arith.constant 0 : index
    %99 = vector.load %arg6[%c12_50, %c0_51] : memref<37x256xf32, #tpu.memory_space<vmem>>, vector<4x256xf32>
    tpu.vector_store %arg6[%c12_50, %c0_51], %98 {strides = array<i32>} : memref<37x256xf32, #tpu.memory_space<vmem>>, vector<4x256xf32>,
    %100 = vector.extract_strided_slice %79 {offsets = [0, 17], sizes = [4, 256], strides = [1, 1]} : vector<4x290xf32> to vector<4x256xf32>
    %c16_52 = arith.constant 16 : index
    %c0_53 = arith.constant 0 : index
    %101 = vector.load %arg6[%c16_52, %c0_53] : memref<37x256xf32, #tpu.memory_space<vmem>>, vector<4x256xf32>
    tpu.vector_store %arg6[%c16_52, %c0_53], %100 {strides = array<i32>} : memref<37x256xf32, #tpu.memory_space<vmem>>, vector<4x256xf32>,
    %102 = vector.extract_strided_slice %79 {offsets = [0, 18], sizes = [4, 256], strides = [1, 1]} : vector<4x290xf32> to vector<4x256xf32>
    %cst_54 = arith.constant 0.000000e+00 : f32
    %103 = vector.shape_cast %20 : vector<1x256xi1> to vector<1x256xi1>
    %104 = vector.broadcast %103 : vector<1x256xi1> to vector<4x256xi1>
    %105 = vector.broadcast %cst_54 : f32 to vector<4x256xf32>
    %106 = arith.select %104, %102, %105 : vector<4x256xi1>, vector<4x256xf32>
    %c20_55 = arith.constant 20 : index
    %c0_56 = arith.constant 0 : index
    %107 = vector.load %arg6[%c20_55, %c0_56] : memref<37x256xf32, #tpu.memory_space<vmem>>, vector<4x256xf32>
    tpu.vector_store %arg6[%c20_55, %c0_56], %106 {strides = array<i32>} : memref<37x256xf32, #tpu.memory_space<vmem>>, vector<4x256xf32>,
    %108 = vector.extract_strided_slice %79 {offsets = [0, 32], sizes = [4, 256], strides = [1, 1]} : vector<4x290xf32> to vector<4x256xf32>
    %cst_57 = arith.constant 0.000000e+00 : f32
    %109 = vector.shape_cast %18 : vector<1x256xi1> to vector<1x256xi1>
    %110 = vector.broadcast %109 : vector<1x256xi1> to vector<4x256xi1>
    %111 = vector.broadcast %cst_57 : f32 to vector<4x256xf32>
    %112 = arith.select %110, %108, %111 : vector<4x256xi1>, vector<4x256xf32>
    %c24_58 = arith.constant 24 : index
    %c0_59 = arith.constant 0 : index
    %113 = vector.load %arg6[%c24_58, %c0_59] : memref<37x256xf32, #tpu.memory_space<vmem>>, vector<4x256xf32>
    tpu.vector_store %arg6[%c24_58, %c0_59], %112 {strides = array<i32>} : memref<37x256xf32, #tpu.memory_space<vmem>>, vector<4x256xf32>,
    %114 = vector.extract_strided_slice %79 {offsets = [0, 33], sizes = [4, 256], strides = [1, 1]} : vector<4x290xf32> to vector<4x256xf32>
    %c28_60 = arith.constant 28 : index
    %c0_61 = arith.constant 0 : index
    %115 = vector.load %arg6[%c28_60, %c0_61] : memref<37x256xf32, #tpu.memory_space<vmem>>, vector<4x256xf32>
    tpu.vector_store %arg6[%c28_60, %c0_61], %114 {strides = array<i32>} : memref<37x256xf32, #tpu.memory_space<vmem>>, vector<4x256xf32>,
    %116 = vector.extract_strided_slice %79 {offsets = [0, 34], sizes = [4, 256], strides = [1, 1]} : vector<4x290xf32> to vector<4x256xf32>
    %cst_62 = arith.constant 0.000000e+00 : f32
    %117 = vector.shape_cast %20 : vector<1x256xi1> to vector<1x256xi1>
    %118 = vector.broadcast %117 : vector<1x256xi1> to vector<4x256xi1>
    %119 = vector.broadcast %cst_62 : f32 to vector<4x256xf32>
    %120 = arith.select %118, %116, %119 : vector<4x256xi1>, vector<4x256xf32>
    %c32_63 = arith.constant 32 : index
    %c0_64 = arith.constant 0 : index
    %121 = vector.load %arg6[%c32_63, %c0_64] : memref<37x256xf32, #tpu.memory_space<vmem>>, vector<4x256xf32>
    tpu.vector_store %arg6[%c32_63, %c0_64], %120 {strides = array<i32>} : memref<37x256xf32, #tpu.memory_space<vmem>>, vector<4x256xf32>,
    %c0_65 = arith.constant 0 : index
    %c0_66 = arith.constant 0 : index
    %c0_67 = arith.constant 0 : index
    %122 = vector.load %arg3[%c0_65, %c0_66, %c0_67] : memref<1x4x37xf32, #tpu.memory_space<vmem>>, vector<1x4x37xf32>
    %123 = vector.shape_cast %122 : vector<1x4x37xf32> to vector<4x37xf32>
    %c0_68 = arith.constant 0 : index
    %c0_69 = arith.constant 0 : index
    %124 = vector.load %arg6[%c0_68, %c0_69] : memref<37x256xf32, #tpu.memory_space<vmem>>, vector<37x256xf32>
    %cst_70 = arith.constant dense<0.000000e+00> : vector<4x256xf32>
    %125 = tpu.matmul %123, %124, %cst_70 {dimension_numbers = #tpu.dot_dimension_numbers<[1], [0], [0], [1], [0, 0, 1, 1], [], []>} : vector<4x37xf32>, vector<37x256xf32>, vector<4x256xf32> -> vector<4x256xf32>
    %126 = arith.addf %125, %28 : vector<4x256xf32>
    %cst_71 = arith.constant 0.000000e+00 : f32
    %127 = vector.broadcast %cst_71 : f32 to vector<4x256xf32>
    %128 = arith.maximumf %126, %127 : vector<4x256xf32>
    %c0_72 = arith.constant 0 : index
    %c0_73 = arith.constant 0 : index
    %c0_74 = arith.constant 0 : index
    %129 = vector.load %arg4[%c0_72, %c0_73, %c0_74] : memref<1x4x256xf32, #tpu.memory_space<vmem>>, vector<1x4x256xf32>
    %130 = vector.shape_cast %129 : vector<1x4x256xf32> to vector<4x256xf32>
    %131 = vector.shape_cast %128 : vector<4x256xf32> to vector<1x4x256xf32>
    tpu.vector_store %arg4[%c0_72, %c0_73, %c0_74], %131 {strides = array<i32>} : memref<1x4x256xf32, #tpu.memory_space<vmem>>, vector<1x4x256xf32>,
    return
  }
  func.func @transform_0(%arg0: i32) -> (i32, i32, i32) {
    %c0_i32 = arith.constant 0 : i32
    %c0_i32_0 = arith.constant 0 : i32
    %c0_i32_1 = arith.constant 0 : i32
    return %arg0, %c0_i32, %c0_i32_0 : i32, i32, i32
  }
  func.func @transform_1(%arg0: i32) -> (i32, i32) {
    %c0_i32 = arith.constant 0 : i32
    %c0_i32_0 = arith.constant 0 : i32
    %c0_i32_1 = arith.constant 0 : i32
    return %c0_i32, %c0_i32_0 : i32, i32
  }
  func.func @transform_2(%arg0: i32) -> (i32, i32, i32) {
    %c0_i32 = arith.constant 0 : i32
    %c0_i32_0 = arith.constant 0 : i32
    %c0_i32_1 = arith.constant 0 : i32
    return %arg0, %c0_i32, %c0_i32_0 : i32, i32, i32
  }
  func.func @transform_3(%arg0: i32) -> (i32, i32, i32) {
    %c0_i32 = arith.constant 0 : i32
    %c0_i32_0 = arith.constant 0 : i32
    %c0_i32_1 = arith.constant 0 : i32
    return %arg0, %c0_i32, %c0_i32_0 : i32, i32, i32
  }
}

</mosaic_0001>

<bundles_post_ra>
// kernel: basic_block_pallas.1
= control target key start
LH: loop header
LB: loop body
LE: loop exit
PB: predicated region body
PF: predicated region fallthrough
CT: control target
= control target key end

     0   :  { %s893_s12 = smov 0   ;;  %s1114_s0 = inlined_call_operand.vmem [shape: f32[2,4,256], index: 0, kind: input, shape index: {}]   ;;  %s1115_s1 = inlined_call_operand.vmem [shape: f32[4,37], index: 1, kind: input, shape index: {}]   ;;  %s1116_s2 = inlined_call_operand.vmem [shape: f32[2,4,37], index: 2, kind: input, shape index: {}]   ;;  %s1117_s3 = inlined_call_operand.vmem [shape: f32[2,4,256], index: 3, kind: output, shape index: {}]  }
   0x1 LB: > { %s793_s13 = sadd.s32 4294967295, %s860_s12   ;;  %p797_p0 = scmp.ge.s32.totalorder %s860_s12, 1  ;;  %s860_s12 = sphi %s893_s12, %s13_s12  }
   0x2   : > { %p146_p1 = scmp.lt.s32.totalorder %s860_s12, 3 }
   0x4   : > { %p147_p2 = pnand %p797_p0, %p146_p1 }
   0x5   : > { %p174_p3 = scmp.lt.s32.totalorder (!%p147_p2), %s793_s13, 1  ;;  %vm219_vm0 = vcmask (!%p147_p2), 134144   ;;  %vm221_vm1 = vcmask (!%p147_p2), 273544   ;;  %v862_v0 = vmov (!%p147_p2), 0.0   ;;  %s863_s18 = smov (!%p147_p2), 17   ;;  %v188_v2 = vlaneseq (!%p147_p2) }
   0x6   : > { %150 = sbr.rel (%p147_p2) target bundleno = 1046 (0x416), region = 32  ;;  %220 = vst.msk [vmem:[#allocation2] sm:$0xf] (!%p147_p2), %vm219_vm0, %v862_v0  ;;  %476 = vmatprep.mubr.f32.mxu0 (!%p147_p2), %v862_v0  ;;  %712 = vmatprep.mubr.f32.mxu1 (!%p147_p2), %v862_v0  ;;  %vm239_vm2 = vcmask (!%p147_p2), 1043592   ;;  %vm240_vm3 = vcmask (!%p147_p2), 1047556   ;;  %vm235_vm4 = vcmask (!%p147_p2), 138240  }
   0x7   : > { %222 = vst.msk [vmem:[#allocation2 + $0x8] sm:$0xf] (!%p147_p2), %vm221_vm1, %v862_v0  ;;  %v914_v3 = vand.u32 (!%p147_p2), 127, %v188_v2  ;;  %vm916_vm5 = vmor (!%p147_p2), %vm240_vm3, %vm239_vm2  ;;  %s864_s19 = smov (!%p147_p2), 96   ;;  %s865_s20 = smov (!%p147_p2), 112   ;;  %vm225_vm8 = vcmp.lt.s32.totalorder (!%p147_p2), %v188_v2, 256 }
   0x8   : > { %s866_s21 = smov (!%p147_p2), 111   ;;  %s867_s22 = smov (!%p147_p2), 126   ;;  %v870_v18 = vmov (!%p147_p2), 1.0   ;;  %vm266_vm9 = vcmask (!%p147_p2), 1039360   ;;  %vm368_vm10 = vcmask (!%p147_p2), 777216   ;;  %vm298_vm11 = vcmask (!%p147_p2), 916480  }
   0x9   : > { %v923_v8 = vadd.s32 (!%p147_p2), 128, %v914_v3  ;;  %v195_v9 = vand.u32 (!%p147_p2), 15, %v914_v3  ;;  %s868_s23 = smov (!%p147_p2), 110   ;;  %s869_s24 = smov (!%p147_p2), 127   ;;  %vm283_vm12 = vcmask (!%p147_p2), 1031168   ;;  %vm353_vm15 = vcmask (!%p147_p2), 785408  }
   0xa   : > { %228 = vst.msk [vmem:[#allocation3 + $0x44] ss:$8 sm:$0x3] (!%p147_p2), %vm225_vm8, %v870_v18  ;;  %s871_s25 = smov (!%p147_p2), 95   ;;  %s872_s26 = smov (!%p147_p2), 94   ;;  %vm332_vm1 = vcmask (!%p147_p2), 900096  }
   0xb   : > { %v202_v10 = vand.u32 (!%p147_p2), 15, %v923_v8  ;;  %vm931_vm6 = vcmp.ge.s32.totalorder (!%p147_p2), %v195_v9, 1  ;;  %vm982_vm13 = vcmp.le.s32.totalorder (!%p147_p2), %v195_v9, 14  ;;  %vm319_vm2 = vcmask (!%p147_p2), 908288  }
   0xc   : > { %vm1118_vm3 = vcmask (!%p147_p2), 769024   ;;  %vm405_vm8 = vcmask (!%p147_p2), 1044480  }
   0xd   : > { %s1132_s13 = smov (!%p174_p3, %s793_s13), 1  ;;  %vm939_vm7 = vcmp.ge.s32.totalorder %v202_v10, 1  ;;  %vm988_vm14 = vcmp.le.s32.totalorder %v202_v10, 14 }
   0xe   : > { %s811_s14 = sshll.u32 %s1132_s13, 3  ;;  %s800_s29 = sshll.u32 %s1132_s13, 2 }
   0xf   : > { %s178_s17 = scalar_lea.vmem %s1114_s0, %s811_s14  ;;  %s182_s5 = scalar_lea.vmem %s1116_s2, %s800_s29 }
  0x10   : > { %v910_v1 = vld [vmem:[%s178_s17] sm:$0xff]  ;;  %s187_s8 = scalar_lea.vmem %s1117_s3, %s811_s14 }
  0x11   : > { %232 = vrot.lane.b32.xlu0 %v910_v1, %s863_s18  ;;  %v637_v44 = vcombine.high %v910_v1, %v910_v1 }
  0x83   : > { %v233_v4 = vpop.permute.xlu0 %232 }
  0x84   : > { %v234_v6 = vrot.slane %v233_v4, 4 }
  0x86   : > { %v236_v7 = vsel %vm235_vm4, %v234_v6, %v233_v4  ;;  %243 = vst.msk [vmem:[#allocation2 + $0x8] sm:$0xf] %vm219_vm0, %v234_v6 }
  0x87   : > { %242 = vst.msk [vmem:[#allocation2] sm:$0xff] %vm916_vm5, %v236_v7 }
  0x8d   : > { %v245_v12 = vld [vmem:[#allocation2 + $0x8] sm:$0xf] }
  0x8e   : > { %351 = vrot.lane.b32.xlu0 %v245_v12, %s864_s19  ;;  %296 = vrot.lane.b32.xlu1 %v245_v12, %s865_s20  ;;  %v244_v13 = vld [vmem:[#allocation2] sm:$0xff]  ;;  %v259_v19 = vcombine.low %v245_v12, %v245_v12 }
  0x8f   : > { %v251_v15 = vcombine.high %v244_v13, %v244_v13  ;;  %v253_v16 = vsel %vm931_vm6, %v244_v13, 0.0  ;;  %v258_v20 = vcombine.low %v244_v13, %v244_v13 }
  0x90   : > { %255 = vst [vmem:[#allocation3] sm:$0xf] %v253_v16 }
  0x91   : > { %v254_v17 = vsel %vm939_vm7, %v251_v15, 0.0 }
  0x92   : > { %317 = vrot.lane.b32.xlu0 %v245_v12, %s866_s21  ;;  %281 = vrot.lane.b32.xlu1 %v245_v12, %s867_s22  ;;  %256 = vst [vmem:[#allocation3 + $0x8] sm:$0xf] %v254_v17 }
  0x96   : > { %330 = vrot.lane.b32.xlu1 %v245_v12, %s868_s23  ;;  %262 = vrot.lane.b32.xlu0 %v244_v13, %s869_s24 }
  0x9a   : > { %277 = vrot.lane.b32.xlu0 %v244_v13, %s867_s22  ;;  %292 = vrot.lane.b32.xlu1 %v244_v13, %s865_s20 }
  0x9e   : > { %326 = vrot.lane.b32.xlu0 %v244_v13, %s868_s23  ;;  %347 = vrot.lane.b32.xlu1 %v244_v13, %s864_s19 }
  0xa2   : > { %364 = vrot.lane.b32.xlu0 %v244_v13, %s871_s25  ;;  %264 = vrot.lane.b32.xlu1 %v259_v19, %s869_s24 }
  0xa6   : > { %366 = vrot.lane.b32.xlu1 %v259_v19, %s871_s25  ;;  %294 = vrot.lane.b32.xlu0 %v251_v15, %s865_s20 }
  0xaa   : > { %260 = vrot.lane.b32.xlu1 %v258_v20, %s869_s24  ;;  %279 = vrot.lane.b32.xlu0 %v251_v15, %s867_s22 }
  0xae   : > { %349 = vrot.lane.b32.xlu1 %v251_v15, %s864_s19  ;;  %328 = vrot.lane.b32.xlu0 %v251_v15, %s868_s23 }
  0xb2   : > { %315 = vrot.lane.b32.xlu1 %v251_v15, %s866_s21  ;;  %313 = vrot.lane.b32.xlu0 %v244_v13, %s866_s21 }
  0xb6   : > { %362 = vrot.lane.b32.xlu1 %v258_v20, %s871_s25  ;;  %377 = vrot.lane.b32.xlu0 %v251_v15, %s872_s26 }
  0xba   : > { %379 = vrot.lane.b32.xlu1 %v245_v12, %s872_s26  ;;  %375 = vrot.lane.b32.xlu0 %v244_v13, %s872_s26 }
 0x100   : > { %v352_v21 = vpop.permute.xlu0 %351  ;;  %v297_v22 = vpop.permute.xlu1 %296 }
 0x104   : > { %v318_v23 = vpop.permute.xlu0 %317  ;;  %v282_v24 = vpop.permute.xlu1 %281 }
 0x108   : > { %v331_v25 = vpop.permute.xlu1 %330  ;;  %v263_v26 = vpop.permute.xlu0 %262 }
 0x10c   : > { %v278_v27 = vpop.permute.xlu0 %277  ;;  %v293_v28 = vpop.permute.xlu1 %292 }
 0x110   : > { %v327_v29 = vpop.permute.xlu0 %326  ;;  %v348_v30 = vpop.permute.xlu1 %347 }
 0x114   : > { %v969_v31 = vpop.permute.xlu0 %364  ;;  %v265_v32 = vpop.permute.xlu1 %264 }
 0x115   : > { %v268_v33 = vsel %vm266_vm9, %v263_v26, %v265_v32 }
 0x116   : > { %272 = vst [vmem:[#allocation3 + $0x8] sm:$0xf0] %v268_v33 }
 0x118   : > { %v367_v34 = vpop.permute.xlu1 %366  ;;  %v295_v35 = vpop.permute.xlu0 %294 }
 0x119   : > { %v370_v36 = vsel %vm368_vm10, %v969_v31, %v367_v34  ;;  %v299_v37 = vsel %vm298_vm11, %v293_v28, %v295_v35  ;;  %v300_v38 = vsel %vm298_vm11, %v295_v35, %v297_v22 }
 0x11a   : > { %374 = vst [vmem:[#allocation3 + $0x38] sm:$0xf0] %v370_v36  ;;  %v303_v39 = vsel %vm931_vm6, %v299_v37, 0.0  ;;  %v304_v40 = vsel %vm939_vm7, %v300_v38, 0.0 }
 0x11b   : > { %v307_v41 = vrot.slane %v303_v39, 4  ;;  %v308_v42 = vrot.slane %v304_v40, 4 }
 0x11c   : > { %v261_v45 = vpop.permute.xlu1 %260  ;;  %v280_v46 = vpop.permute.xlu0 %279 }
 0x11d   : > { %311 = vst [vmem:[#allocation3 + $0x10] sm:$0xf0] %v307_v41  ;;  %312 = vst [vmem:[#allocation3 + $0x18] sm:$0xf0] %v308_v42  ;;  %v267_v47 = vsel %vm266_vm9, %v261_v45, %v263_v26  ;;  %v284_v48 = vsel %vm283_vm12, %v278_v27, %v280_v46  ;;  %v285_v49 = vsel %vm283_vm12, %v280_v46, %v282_v24  ;;  %v392_v7 = vld [vmem:[#allocation3 + $0x8] sm:$0xff] }
 0x11e   : > { %271 = vst [vmem:[#allocation3] sm:$0xf0] %v267_v47  ;;  %v288_v50 = vsel %vm982_vm13, %v284_v48, 0.0  ;;  %v289_v51 = vsel %vm988_vm14, %v285_v49, 0.0 }
 0x11f   : > { %290 = vst [vmem:[#allocation3 + $0x10] sm:$0xf] %v288_v50  ;;  %291 = vst [vmem:[#allocation3 + $0x18] sm:$0xf] %v289_v51 }
 0x120   : > { %v350_v52 = vpop.permute.xlu1 %349  ;;  %v329_v53 = vpop.permute.xlu0 %328 }
 0x121   : > { %v354_v54 = vsel %vm353_vm15, %v348_v30, %v350_v52  ;;  %v355_v55 = vsel %vm353_vm15, %v350_v52, %v352_v21  ;;  %v333_v56 = vsel %vm332_vm1, %v327_v29, %v329_v53  ;;  %v334_v57 = vsel %vm332_vm1, %v329_v53, %v331_v25  ;;  %v390_v29 = vld [vmem:[%s1115_s1] sm:$0xf] }
 0x122   : > { %v358_v58 = vsel %vm931_vm6, %v354_v54, 0.0  ;;  %v359_v59 = vsel %vm939_vm7, %v355_v55, 0.0  ;;  %v337_v60 = vsel %vm982_vm13, %v333_v56, 0.0  ;;  %v338_v61 = vsel %vm988_vm14, %v334_v57, 0.0 }
 0x123   : > { %360 = vst [vmem:[#allocation3 + $0x30] sm:$0xf] %v358_v58  ;;  %361 = vst [vmem:[#allocation3 + $0x38] sm:$0xf] %v359_v59  ;;  %v341_v62 = vrot.slane %v337_v60, 4  ;;  %v342_v63 = vrot.slane %v338_v61, 4 }
 0x124   : > { %v316_v0 = vpop.permute.xlu1 %315  ;;  %v314_v2 = vpop.permute.xlu0 %313 }
 0x125   : > { %345 = vst [vmem:[#allocation3 + $0x20] sm:$0xf0] %v341_v62  ;;  %346 = vst [vmem:[#allocation3 + $0x28] sm:$0xf0] %v342_v63  ;;  %v321_v3 = vsel %vm319_vm2, %v316_v0, %v318_v23  ;;  %v320_v4 = vsel %vm319_vm2, %v314_v2, %v316_v0  ;;  %v391_v6 = vld [vmem:[#allocation3] sm:$0xff] }
 0x126   : > { %325 = vst [vmem:[#allocation3 + $0x28] sm:$0xf] %v321_v3  ;;  %324 = vst [vmem:[#allocation3 + $0x20] sm:$0xf] %v320_v4  ;;  %v394_v8 = vld [vmem:[#allocation3 + $0x18] sm:$0xff]  ;;  %v393_v9 = vld [vmem:[#allocation3 + $0x10] sm:$0xff] }
 0x127   : > { %v813_v10 = vpack.c.bf16 %v394_v8, %v392_v7  ;;  %v815_v12 = vpack.c.bf16 %v393_v9, %v391_v6 }
 0x128   : > { %v363_v13 = vpop.permute.xlu1 %362  ;;  %v378_v15 = vpop.permute.xlu0 %377 }
 0x129   : > { %v369_v16 = vsel %vm368_vm10, %v363_v13, %v969_v31  ;;  %814 = vmatprep.subr.bf16.mxu0 %v813_v10 }
 0x12a   : > { %373 = vst [vmem:[#allocation3 + $0x30] sm:$0xf0] %v369_v16  ;;  %816 = vmatpush1.bf16.msra.mxu0 %v815_v12  ;;  %v398_v22 = vld [vmem:[#allocation3 + $0x38] sm:$0xff] }
 0x12c   : > { %v380_v17 = vpop.permute.xlu1 %379  ;;  %v376_v18 = vpop.permute.xlu0 %375 }
 0x12d   : > { %v383_v19 = vsel %vm1118_vm3, %v378_v15, %v380_v17  ;;  %v382_v20 = vsel %vm1118_vm3, %v376_v18, %v378_v15  ;;  %v396_v21 = vld [vmem:[#allocation3 + $0x28] sm:$0xff]  ;;  %v395_v26 = vld [vmem:[#allocation3 + $0x20] sm:$0xff]  ;;  %vm401_vm3 = vcmask 302080  }
 0x12e   : > { %v387_v23 = vsel %vm988_vm14, %v383_v19, 0.0  ;;  %v386_v24 = vsel %vm982_vm13, %v382_v20, 0.0  ;;  %v817_v25 = vpack.c.bf16 %v398_v22, %v396_v21 }
 0x12f   : > { %389 = vst [vmem:[#allocation3 + $0x48] sm:$0xf] %v387_v23  ;;  %388 = vst [vmem:[#allocation3 + $0x40] sm:$0xf] %v386_v24 }
 0x130   : > { %818 = vmatprep.subr.bf16.mxu0 %v817_v25 }
 0x131   : > { %v397_v27 = vld [vmem:[#allocation3 + $0x30] sm:$0xff] }
 0x132   : > { %v819_v28 = vpack.c.bf16 %v397_v27, %v395_v26 }
 0x134   : > { %820 = vmatpush1.bf16.msra.mxu0 %v819_v28 }
 0x136   : > { %v400_v30 = vld [vmem:[#allocation3 + $0x48] sm:$0x1f]  ;;  %v399_v31 = vld [vmem:[#allocation3 + $0x40] sm:$0x1f] }
 0x137   : > { %803 = vmatprep.subr.msk.mxu0 %vm405_vm8, %v400_v30 }
 0x138   : > { %804 = vmatpush1.msk.msra.mxu0 %vm405_vm8, %v399_v31 }
 0x139   : > { %805 = vmatmul.mubr.msk.f32.vlgmr.msra.gmra.mrb[0].mxu0 %vm401_vm3, %v390_v29 }
 0x20c   : > { %v478_v32 = vpop.f32.mrb[0].mxu0 }
 0x20d   : > { %v483_v33 = vmax.f32 %v478_v32, 0.0  ;;  %v480_v34 = vpop.f32.mrb[1].mxu0 }
 0x20e   : > { %v484_v35 = vmax.f32 %v480_v34, 0.0 }
 0x210   : > { %v487_v36 = vcombine.low %v483_v33, %v484_v35 }
 0x212   : > { %488 = vrot.lane.b32.xlu1 %v487_v36, %s863_s18 }
 0x284   : > { %v489_v37 = vpop.permute.xlu1 %488 }
 0x285   : > { %v490_v38 = vrot.slane %v489_v37, 4 }
 0x287   : > { %v491_v39 = vsel %vm235_vm4, %v490_v38, %v489_v37  ;;  %495 = vst.msk [vmem:[#allocation2 + $0x8] sm:$0xf] %vm219_vm0, %v490_v38  ;;  %vm1129_vm0 = vcmask 769024  }
 0x288   : > { %494 = vst.msk [vmem:[#allocation2] sm:$0xff] %vm916_vm5, %v491_v39  ;;  %vm1130_vm4 = vmmov %vm1129_vm0 }
 0x28e   : > { %v497_v40 = vld [vmem:[#allocation2 + $0x8] sm:$0xf] }
 0x28f   : > { %524 = vrot.lane.b32.xlu0 %v497_v40, %s867_s22  ;;  %538 = vrot.lane.b32.xlu1 %v497_v40, %s865_s20  ;;  %v496_v41 = vld [vmem:[#allocation2] sm:$0xff]  ;;  %v507_v5 = vcombine.low %v497_v40, %v497_v40 }
 0x290   : > { %v499_v42 = vcombine.high %v496_v41, %v496_v41  ;;  %v501_v45 = vsel %vm931_vm6, %v496_v41, 0.0  ;;  %v506_v47 = vcombine.low %v496_v41, %v496_v41 }
 0x291   : > { %503 = vst [vmem:[#allocation3] sm:$0xf] %v501_v45 }
 0x292   : > { %v502_v46 = vsel %vm939_vm7, %v499_v42, 0.0 }
 0x293   : > { %570 = vrot.lane.b32.xlu0 %v497_v40, %s868_s23  ;;  %590 = vrot.lane.b32.xlu1 %v497_v40, %s864_s19  ;;  %504 = vst [vmem:[#allocation3 + $0x8] sm:$0xf] %v502_v46 }
 0x297   : > { %558 = vrot.lane.b32.xlu1 %v497_v40, %s866_s21  ;;  %534 = vrot.lane.b32.xlu0 %v496_v41, %s865_s20 }
 0x29b   : > { %510 = vrot.lane.b32.xlu1 %v496_v41, %s869_s24  ;;  %586 = vrot.lane.b32.xlu0 %v496_v41, %s864_s19 }
 0x29f   : > { %520 = vrot.lane.b32.xlu1 %v496_v41, %s867_s22  ;;  %512 = vrot.lane.b32.xlu0 %v507_v5, %s869_s24 }
 0x2a3   : > { %566 = vrot.lane.b32.xlu1 %v496_v41, %s868_s23  ;;  %604 = vrot.lane.b32.xlu0 %v507_v5, %s871_s25 }
 0x2a7   : > { %602 = vrot.lane.b32.xlu1 %v496_v41, %s871_s25  ;;  %536 = vrot.lane.b32.xlu0 %v499_v42, %s865_s20 }
 0x2ab   : > { %522 = vrot.lane.b32.xlu1 %v499_v42, %s867_s22  ;;  %508 = vrot.lane.b32.xlu0 %v506_v47, %s869_s24 }
 0x2af   : > { %568 = vrot.lane.b32.xlu1 %v499_v42, %s868_s23  ;;  %588 = vrot.lane.b32.xlu0 %v499_v42, %s864_s19 }
 0x2b3   : > { %554 = vrot.lane.b32.xlu1 %v496_v41, %s866_s21  ;;  %556 = vrot.lane.b32.xlu0 %v499_v42, %s866_s21 }
 0x2b7   : > { %614 = vrot.lane.b32.xlu1 %v499_v42, %s872_s26  ;;  %600 = vrot.lane.b32.xlu0 %v506_v47, %s871_s25 }
 0x2bb   : > { %612 = vrot.lane.b32.xlu1 %v496_v41, %s872_s26  ;;  %616 = vrot.lane.b32.xlu0 %v497_v40, %s872_s26 }
 0x301   : > { %v525_v48 = vpop.permute.xlu0 %524  ;;  %v539_v49 = vpop.permute.xlu1 %538 }
 0x305   : > { %v571_v50 = vpop.permute.xlu0 %570  ;;  %v591_v51 = vpop.permute.xlu1 %590 }
 0x309   : > { %v559_v52 = vpop.permute.xlu1 %558  ;;  %v535_v53 = vpop.permute.xlu0 %534 }
 0x30d   : > { %v511_v54 = vpop.permute.xlu1 %510  ;;  %v587_v55 = vpop.permute.xlu0 %586 }
 0x311   : > { %v521_v56 = vpop.permute.xlu1 %520  ;;  %v513_v57 = vpop.permute.xlu0 %512 }
 0x312   : > { %v515_v58 = vsel %vm266_vm9, %v511_v54, %v513_v57 }
 0x313   : > { %519 = vst [vmem:[#allocation3 + $0x8] sm:$0xf0] %v515_v58 }
 0x315   : > { %v567_v59 = vpop.permute.xlu1 %566  ;;  %v605_v60 = vpop.permute.xlu0 %604 }
 0x319   : > { %v603_v61 = vpop.permute.xlu1 %602  ;;  %v537_v62 = vpop.permute.xlu0 %536 }
 0x31a   : > { %v607_v63 = vsel %vm368_vm10, %v603_v61, %v605_v60  ;;  %v540_v0 = vsel %vm298_vm11, %v535_v53, %v537_v62  ;;  %v541_v2 = vsel %vm298_vm11, %v537_v62, %v539_v49  ;;  %v628_v11 = vld [vmem:[#allocation3 + $0x8] sm:$0xff] }
 0x31b   : > { %611 = vst [vmem:[#allocation3 + $0x38] sm:$0xf0] %v607_v63  ;;  %v544_v3 = vsel %vm931_vm6, %v540_v0, 0.0  ;;  %v545_v4 = vsel %vm939_vm7, %v541_v2, 0.0 }
 0x31c   : > { %v548_v6 = vrot.slane %v544_v3, 4  ;;  %v549_v7 = vrot.slane %v545_v4, 4 }
 0x31d   : > { %v523_v8 = vpop.permute.xlu1 %522  ;;  %v509_v9 = vpop.permute.xlu0 %508 }
 0x31e   : > { %552 = vst [vmem:[#allocation3 + $0x10] sm:$0xf0] %v548_v6  ;;  %553 = vst [vmem:[#allocation3 + $0x18] sm:$0xf0] %v549_v7  ;;  %v526_v10 = vsel %vm283_vm12, %v521_v56, %v523_v8  ;;  %v527_v12 = vsel %vm283_vm12, %v523_v8, %v525_v48  ;;  %v514_v13 = vsel %vm266_vm9, %v509_v9, %v511_v54  ;;  %v626_v54 = vld [vmem:[%s182_s5] sm:$0xf] }
 0x31f   : > { %v530_v15 = vsel %vm982_vm13, %v526_v10, 0.0  ;;  %v531_v16 = vsel %vm988_vm14, %v527_v12, 0.0  ;;  %518 = vst [vmem:[#allocation3] sm:$0xf0] %v514_v13 }
 0x320   : > { %532 = vst [vmem:[#allocation3 + $0x10] sm:$0xf] %v530_v15  ;;  %533 = vst [vmem:[#allocation3 + $0x18] sm:$0xf] %v531_v16 }
 0x321   : > { %v569_v17 = vpop.permute.xlu1 %568  ;;  %v589_v18 = vpop.permute.xlu0 %588 }
 0x322   : > { %v572_v19 = vsel %vm332_vm1, %v567_v59, %v569_v17  ;;  %v573_v20 = vsel %vm332_vm1, %v569_v17, %v571_v50  ;;  %v592_v21 = vsel %vm353_vm15, %v587_v55, %v589_v18  ;;  %v593_v22 = vsel %vm353_vm15, %v589_v18, %v591_v51 }
 0x323   : > { %v576_v23 = vsel %vm982_vm13, %v572_v19, 0.0  ;;  %v577_v24 = vsel %vm988_vm14, %v573_v20, 0.0  ;;  %v596_v25 = vsel %vm931_vm6, %v592_v21, 0.0  ;;  %v597_v26 = vsel %vm939_vm7, %v593_v22, 0.0 }
 0x324   : > { %v580_v27 = vrot.slane %v576_v23, 4  ;;  %v581_v28 = vrot.slane %v577_v24, 4  ;;  %598 = vst [vmem:[#allocation3 + $0x30] sm:$0xf] %v596_v25  ;;  %599 = vst [vmem:[#allocation3 + $0x38] sm:$0xf] %v597_v26 }
 0x325   : > { %v555_v29 = vpop.permute.xlu1 %554  ;;  %v557_v30 = vpop.permute.xlu0 %556 }
 0x326   : > { %584 = vst [vmem:[#allocation3 + $0x20] sm:$0xf0] %v580_v27  ;;  %585 = vst [vmem:[#allocation3 + $0x28] sm:$0xf0] %v581_v28  ;;  %v560_v31 = vsel %vm319_vm2, %v555_v29, %v557_v30  ;;  %v561_v32 = vsel %vm319_vm2, %v557_v30, %v559_v52  ;;  %v627_v33 = vld [vmem:[#allocation3] sm:$0xff] }
 0x327   : > { %564 = vst [vmem:[#allocation3 + $0x20] sm:$0xf] %v560_v31  ;;  %565 = vst [vmem:[#allocation3 + $0x28] sm:$0xf] %v561_v32  ;;  %v630_v34 = vld [vmem:[#allocation3 + $0x18] sm:$0xff]  ;;  %v629_v35 = vld [vmem:[#allocation3 + $0x10] sm:$0xff] }
 0x328   : > { %v821_v14 = vpack.c.bf16 %v630_v34, %v628_v11  ;;  %v823_v36 = vpack.c.bf16 %v629_v35, %v627_v33 }
 0x329   : > { %v615_v37 = vpop.permute.xlu1 %614  ;;  %v601_v38 = vpop.permute.xlu0 %600 }
 0x32a   : > { %v606_v39 = vsel %vm368_vm10, %v601_v38, %v603_v61  ;;  %822 = vmatprep.subr.bf16.mxu1 %v821_v14 }
 0x32b   : > { %610 = vst [vmem:[#allocation3 + $0x30] sm:$0xf0] %v606_v39  ;;  %824 = vmatpush1.bf16.msra.mxu1 %v823_v36  ;;  %v634_v5 = vld [vmem:[#allocation3 + $0x38] sm:$0xff] }
 0x32d   : > { %v613_v40 = vpop.permute.xlu1 %612  ;;  %v617_v41 = vpop.permute.xlu0 %616 }
 0x32e   : > { %v618_v42 = vsel %vm1129_vm0, %v613_v40, %v615_v37  ;;  %v619_v45 = vsel %vm1130_vm4, %v615_v37, %v617_v41  ;;  %v632_v46 = vld [vmem:[#allocation3 + $0x28] sm:$0xff]  ;;  %v631_v50 = vld [vmem:[#allocation3 + $0x20] sm:$0xff] }
 0x32f   : > { %v622_v47 = vsel %vm982_vm13, %v618_v42, 0.0  ;;  %v623_v48 = vsel %vm988_vm14, %v619_v45, 0.0  ;;  %v825_v49 = vpack.c.bf16 %v634_v5, %v632_v46 }
 0x330   : > { %624 = vst [vmem:[#allocation3 + $0x40] sm:$0xf] %v622_v47  ;;  %625 = vst [vmem:[#allocation3 + $0x48] sm:$0xf] %v623_v48 }
 0x331   : > { %826 = vmatprep.subr.bf16.mxu1 %v825_v49 }
 0x332   : > { %v633_v51 = vld [vmem:[#allocation3 + $0x30] sm:$0xff] }
 0x333   : > { %v827_v52 = vpack.c.bf16 %v633_v51, %v631_v50 }
 0x335   : > { %828 = vmatpush1.bf16.msra.mxu1 %v827_v52 }
 0x337   : > { %v636_v53 = vld [vmem:[#allocation3 + $0x48] sm:$0x1f]  ;;  %v635_v43 = vld [vmem:[#allocation3 + $0x40] sm:$0x1f] }
 0x338   : > { %806 = vmatprep.subr.msk.mxu1 %vm405_vm8, %v636_v53 }
 0x339   : > { %807 = vmatpush1.msk.msra.mxu1 %vm405_vm8, %v635_v43 }
 0x33a   : > { %808 = vmatmul.mubr.msk.f32.vlgmr.msra.gmra.mrb[0].mxu1 %vm401_vm3, %v626_v54 }
 0x40d   : > { %v714_v55 = vpop.f32.mrb[0].mxu1 }
 0x40e   : > { %v715_v56 = vadd.f32 %v714_v55, %v910_v1  ;;  %v716_v57 = vpop.f32.mrb[1].mxu1 }
 0x40f   : > { %v717_v58 = vadd.f32 %v716_v57, %v637_v44 }
 0x410   : > { %v719_v59 = vmax.f32 %v715_v56, 0.0 }
 0x411   : > { %v720_v60 = vmax.f32 %v717_v58, 0.0 }
 0x413   : > { %v723_v61 = vcombine.low %v719_v59, %v720_v60 }
 0x415   : > { %725 = vst [vmem:[%s187_s8] sm:$0xff] %v723_v61 }
 0x416 PF: > { %s13_s12 = sadd.s32 1, %s860_s12  }
 0x417   : > { %p10_p4 = scmp.ge.s32.totalorder %s13_s12, 4  }
 0x419   :  { %12 = sbr.rel (!%p10_p4) target bundleno = 1 (0x1), region = 66 }

</bundles_post_ra>
